<compile_context>
chip_gen: v5e
topology: v5e:2x2
jax: 0.10.0
libtpu: 0.0.40
codegen_flags: <defaults>
</compile_context>

<pallas_src>
import functools

import jax
import jax.numpy as jnp
from jax.experimental import pallas as pl
from jax.experimental.pallas import tpu as pltpu

# -------- deterministic "config" values (cfg.GROUNDINGDINO / cfg.MODEL.DYHEAD) --------
TOKEN_ALPHA = 0.25
TOKEN_GAMMA = 2.0
WEIGHT_DICT = {"loss_ce": 2.0, "loss_bbox": 5.0, "loss_giou": 2.0}

_GIOU_EPS = 1e-7  # cheap insurance against degenerate boxes (reference has none)


# ----------------------------------------------------------------------------------
# Fused Pallas kernel: token sigmoid focal loss (summed over valid tokens) +
# matched-pair box losses (L1 sum, sum(1 - GIoU)) as an epilogue.
# ----------------------------------------------------------------------------------
def _focal_box_kernel(logits_ref, tgt_ref, mask_ref, sbox_ref, tbox_ref,
                      out_ref, acc_ref, *, alpha, gamma, q_total, tq):
    i = pl.program_id(0)
    n = pl.num_programs(0)

    @pl.when(i == 0)
    def _init():
        acc_ref[...] = jnp.zeros_like(acc_ref)

    x = logits_ref[...].astype(jnp.float32)       # (B, tq, T)
    t = tgt_ref[...].astype(jnp.float32)          # (B, tq, T)
    m = mask_ref[...].astype(jnp.float32)         # (B, T)

    # ---- focal loss, EUP-lean formulation ----
    # e = exp(-|x|) is computed once and shared between the sigmoid and the
    # numerically-stable BCE-with-logits log term.
    ax = jnp.abs(x)
    e = jnp.exp(-ax)                                    # 1x EUP exp
    log_term = jnp.log(1.0 + e)                         # 1x EUP log
    ce = jnp.maximum(x, 0.0) - x * t + log_term
    inv_1pe = pl.reciprocal(1.0 + e, approx=True)       # EUP vrcp (cheap slot)
    p = jnp.where(x >= 0.0, inv_1pe, e * inv_1pe)       # sigmoid(x)

    p_t = p * t + (1.0 - p) * (1.0 - t)
    one_minus_pt = 1.0 - p_t
    if gamma == 2.0:
        focal = one_minus_pt * one_minus_pt
    else:
        focal = one_minus_pt ** gamma
    alpha_t = alpha * t + (1.0 - alpha) * (1.0 - t)
    loss = alpha_t * ce * focal
    loss = loss * m[:, None, :]                   # masked_select + sum == mask-mul + sum

    # tail-tile mask when Q is not divisible by tq (e.g. Q=900, tq=256)
    if q_total % tq != 0:
        q_idx = i * tq + jax.lax.broadcasted_iota(jnp.int32, loss.shape, 1)
        loss = jnp.where(q_idx < q_total, loss, 0.0)

    # elementwise (VPU) accumulate; no per-step cross-lane reduce, no SMEM RMW
    acc_ref[...] += loss

    @pl.when(i == n - 1)
    def _finalize():
        ce_sum = jnp.sum(acc_ref[...])            # single XLU reduce

        # ---- fused box-loss epilogue (boxes are tiny: (4, M) lane layout) ----
        s = sbox_ref[...].astype(jnp.float32)     # (4, M) rows: cx, cy, w, h
        tb = tbox_ref[...].astype(jnp.float32)

        l1 = jnp.sum(jnp.abs(s - tb))

        scx, scy, sw, sh = s[0:1, :], s[1:2, :], s[2:3, :], s[3:4, :]
        tcx, tcy, tw, th = tb[0:1, :], tb[1:2, :], tb[2:3, :], tb[3:4, :]
        sx0, sy0 = scx - 0.5 * sw, scy - 0.5 * sh
        sx1, sy1 = scx + 0.5 * sw, scy + 0.5 * sh
        tx0, ty0 = tcx - 0.5 * tw, tcy - 0.5 * th
        tx1, ty1 = tcx + 0.5 * tw, tcy + 0.5 * th

        area_s = (sx1 - sx0) * (sy1 - sy0)
        area_t = (tx1 - tx0) * (ty1 - ty0)

        ix0 = jnp.maximum(sx0, tx0)
        iy0 = jnp.maximum(sy0, ty0)
        ix1 = jnp.minimum(sx1, tx1)
        iy1 = jnp.minimum(sy1, ty1)
        inter = jnp.maximum(ix1 - ix0, 0.0) * jnp.maximum(iy1 - iy0, 0.0)
        union = area_s + area_t - inter
        iou = inter / (union + _GIOU_EPS)

        ex0 = jnp.minimum(sx0, tx0)
        ey0 = jnp.minimum(sy0, ty0)
        ex1 = jnp.maximum(sx1, tx1)
        ey1 = jnp.maximum(sy1, ty1)
        area_e = jnp.maximum(ex1 - ex0, 0.0) * jnp.maximum(ey1 - ey0, 0.0)
        giou = iou - (area_e - union) / (area_e + _GIOU_EPS)
        giou_sum = jnp.sum(1.0 - giou)

        out_ref[0, 0] = ce_sum
        out_ref[0, 1] = l1
        out_ref[0, 2] = giou_sum


def _pick_tq(q, max_tq=256):
    """Largest query tile: full Q if small, else a multiple of 8 up to max_tq."""
    if q <= max_tq:
        return q
    return max(8, (max_tq // 8) * 8)


def focal_and_box_losses(pred_logits, target_classes, text_mask,
                         src_boxes, tgt_boxes,
                         alpha=TOKEN_ALPHA, gamma=TOKEN_GAMMA, max_tq=256):
    """Returns (ce_sum, l1_sum, giou_sum) computed in one fused pallas_call."""
    B, Q, T = pred_logits.shape
    tq = _pick_tq(Q, max_tq)
    grid = pl.cdiv(Q, tq)
    M = src_boxes.shape[0]

    # (4, M) layout: M maps to lanes; boxes are tiny so this transpose is free.
    src_t = jnp.transpose(src_boxes.astype(jnp.float32))   # (4, M)
    tgt_t = jnp.transpose(tgt_boxes.astype(jnp.float32))   # (4, M)
    mask_i32 = text_mask.astype(jnp.int32)                  # tiny (B, T)

    kern = functools.partial(_focal_box_kernel, alpha=alpha, gamma=gamma,
                             q_total=Q, tq=tq)

    out = pl.pallas_call(
        kern,
        out_shape=jax.ShapeDtypeStruct((1, 3), jnp.float32),
        grid_spec=pltpu.PrefetchScalarGridSpec(
            num_scalar_prefetch=0,
            grid=(grid,),
            in_specs=[
                pl.BlockSpec((B, tq, T), lambda i: (0, i, 0)),   # logits (native dtype)
                pl.BlockSpec((B, tq, T), lambda i: (0, i, 0)),   # targets (native dtype)
                pl.BlockSpec((B, T), lambda i: (0, 0)),          # text mask
                pl.BlockSpec((4, M), lambda i: (0, 0)),          # matched src boxes
                pl.BlockSpec((4, M), lambda i: (0, 0)),          # matched tgt boxes
            ],
            out_specs=pl.BlockSpec((1, 3), lambda i: (0, 0),
                                   memory_space=pltpu.MemorySpace.SMEM),
            scratch_shapes=[pltpu.VMEM((B, tq, T), jnp.float32)],
        ),
        compiler_params=pltpu.CompilerParams(
            dimension_semantics=("arbitrary",),     # sequential accumulation over Q tiles
        ),
    )(pred_logits, target_classes, mask_i32, src_t, tgt_t)
    return out[0, 0], out[0, 1], out[0, 2]


# ----------------------------------------------------------------------------------
# SetCriterion forward (JAX glue around the fused Pallas kernel).
# ----------------------------------------------------------------------------------
class SetCriterionPallas:
    def __init__(self, weight_dict=WEIGHT_DICT, alpha=TOKEN_ALPHA, gamma=TOKEN_GAMMA):
        self.weight_dict = dict(weight_dict)
        self.alpha = alpha
        self.gamma = gamma

    def _matcher(self, outputs, targets, positive_map):
        # TODO(synk): Hungarian matching (scipy.optimize.linear_sum_assignment) is a
        # serial, data-dependent algorithm with no clean Pallas equivalent; use a
        # deterministic identity assignment (target j -> query j) as a stand-in matcher.
        indices = []
        for t in targets:
            n = t["boxes"].shape[0]
            indices.append((jnp.arange(n, dtype=jnp.int32),
                            jnp.arange(n, dtype=jnp.int32)))
        return indices

    def __call__(self, outputs, targets, text_mask, positive_map):
        pred_logits = outputs["pred_logits"]            # (B, Q, T)
        pred_boxes = outputs["pred_boxes"]              # (B, Q, 4)
        B, Q, T = pred_logits.shape

        indices = self._matcher(outputs, targets, positive_map)

        # num_boxes = clamp(len(positive_map) / world_size, min=1)  (world_size == 1)
        num_boxes = float(max(positive_map.shape[0], 1))

        # ----- _get_src_permutation_idx -----
        batch_idx = jnp.concatenate(
            [jnp.full_like(src, i) for i, (src, _) in enumerate(indices)])
        src_idx = jnp.concatenate([src for src, _ in indices])

        # ----- loss_labels: build target_classes [B, Q, T] (same dtype as logits,
        #       no wrapper up-cast; kernel casts after load) -----
        sizes = [int(t["boxes"].shape[0]) for t in targets]
        offsets = [0]
        for s in sizes[:-1]:
            offsets.append(offsets[-1] + s)
        pos_map_o = jnp.concatenate(
            [positive_map[off + J] for off, (_, J) in zip(offsets, indices)], axis=0)

        target_classes = jnp.zeros((B, Q, T), dtype=pred_logits.dtype)
        target_classes = target_classes.at[batch_idx, src_idx].set(
            pos_map_o.astype(pred_logits.dtype))
        unmatched = jnp.zeros((T,), dtype=pred_logits.dtype).at[-1].set(1.0)
        no_pos = (target_classes.sum(-1) == 0)[..., None]
        target_classes = jnp.where(no_pos, unmatched, target_classes)

        # ----- loss_boxes gather -----
        src_boxes = pred_boxes[batch_idx, src_idx]                           # (M, 4)
        tgt_boxes = jnp.concatenate(
            [t["boxes"][J] for t, (_, J) in zip(targets, indices)], axis=0)  # (M, 4)

        # ----- single fused Pallas call: focal-loss sum + L1 sum + (1 - GIoU) sum -----
        ce_sum, l1_sum, giou_sum = focal_and_box_losses(
            pred_logits, target_classes, text_mask, src_boxes, tgt_boxes,
            alpha=self.alpha, gamma=self.gamma)

        losses = {
            "loss_ce": ce_sum / num_boxes,
            "loss_bbox": l1_sum / num_boxes,
            "loss_giou": giou_sum / num_boxes,
        }

        # weight application (same overwrite-with-weighted behaviour as the reference)
        new_losses = {}
        for k, v in losses.items():
            for name, weight in self.weight_dict.items():
                if name in k:
                    new_losses[k] = v * weight
        losses.update(new_losses)
        return losses


# ----------------------------------------------------------------------------------
if __name__ == "__main__":
    key = jax.random.PRNGKey(0)
    B, Q, T = 2, 16, 16           # batch, num_queries, num_text_tokens
    n_boxes = [3, 2]              # targets per image
    M = sum(n_boxes)

    k1, k2, k3, k4, k5 = jax.random.split(key, 5)

    pred_logits = jax.random.normal(k1, (B, Q, T), dtype=jnp.float32)
    cxcy = jax.random.uniform(k2, (B, Q, 2), minval=0.2, maxval=0.8)
    wh = jax.random.uniform(k3, (B, Q, 2), minval=0.1, maxval=0.3)
    pred_boxes = jnp.concatenate([cxcy, wh], axis=-1)                 # (B, Q, 4) cxcywh

    # targets: per-image dicts with normalized cxcywh boxes
    tgt_cxcy = jax.random.uniform(k4, (M, 2), minval=0.2, maxval=0.8)
    tgt_wh = jax.random.uniform(k5, (M, 2), minval=0.1, maxval=0.3)
    all_tgt = jnp.concatenate([tgt_cxcy, tgt_wh], axis=-1)
    targets = [{"boxes": all_tgt[:n_boxes[0]]},
               {"boxes": all_tgt[n_boxes[0]:]}]

    # positive_map: one-hot token assignment per target box, (M, T)
    tok_ids = jnp.array([1, 4, 7, 2, 9], dtype=jnp.int32)
    positive_map = jax.nn.one_hot(tok_ids, T, dtype=jnp.float32)

    # text_mask: valid tokens per image, (B, T) bool
    text_mask = jnp.stack([jnp.arange(T) < 12, jnp.arange(T) < 10])

    criterion = SetCriterionPallas()
    outputs = {"pred_logits": pred_logits, "pred_boxes": pred_boxes}
    losses = criterion(outputs, targets, text_mask, positive_map)

    for v in losses.values():
        jax.block_until_ready(v)

    print("KERNEL_OK")
</pallas_src>

<mosaic_0001>
module attributes {stable_mosaic.version = 11 : i64} {
  func.func @_focal_box_kernel(%arg0: i32, %arg1: memref<2x16x16xf32, #tpu.memory_space<vmem>>, %arg2: memref<2x16x16xf32, #tpu.memory_space<vmem>>, %arg3: memref<2x16xi32, #tpu.memory_space<vmem>>, %arg4: memref<4x5xf32, #tpu.memory_space<vmem>>, %arg5: memref<4x5xf32, #tpu.memory_space<vmem>>, %arg6: memref<1x3xf32, #tpu.memory_space<smem>>, %arg7: memref<2x16x16xf32, #tpu.memory_space<vmem>>) attributes {dimension_semantics = [#tpu.dimension_semantics<arbitrary>], iteration_bounds = array<i64: 1>, scalar_prefetch = 0 : i64, scratch_operands = 1 : i64, tpu.core_type = #tpu.core_type<tc>, window_params = [{transform_indices = @transform_0, window_bounds = array<i64: 2, 16, 16>}, {transform_indices = @transform_1, window_bounds = array<i64: 2, 16, 16>}, {pipeline_mode = #tpu.pipeline_mode<synchronous>, transform_indices = @transform_2, window_bounds = array<i64: 2, 16>}, {pipeline_mode = #tpu.pipeline_mode<synchronous>, transform_indices = @transform_3, window_bounds = array<i64: 4, 5>}, {pipeline_mode = #tpu.pipeline_mode<synchronous>, transform_indices = @transform_4, window_bounds = array<i64: 4, 5>}, {transform_indices = @transform_5, window_bounds = array<i64: 1, 3>}]} {
    %c0_i32 = arith.constant 0 : i32
    %0 = arith.cmpi eq, %arg0, %c0_i32 : i32
    %1 = arith.extui %0 : i1 to i32
    %c0_i32_0 = arith.constant 0 : i32
    %2 = arith.cmpi ne, %1, %c0_i32_0 : i32
    scf.if %2 {
      %cst_26 = arith.constant 0.000000e+00 : f32
      %54 = vector.broadcast %cst_26 : f32 to vector<2x16x16xf32>
      %c0_27 = arith.constant 0 : index
      %c0_28 = arith.constant 0 : index
      %c0_29 = arith.constant 0 : index
      %55 = vector.load %arg7[%c0_27, %c0_28, %c0_29] : memref<2x16x16xf32, #tpu.memory_space<vmem>>, vector<2x16x16xf32>
      tpu.vector_store %arg7[%c0_27, %c0_28, %c0_29], %54 {strides = array<i32>} : memref<2x16x16xf32, #tpu.memory_space<vmem>>, vector<2x16x16xf32>,
    } else {
    }
    %c0 = arith.constant 0 : index
    %c0_1 = arith.constant 0 : index
    %c0_2 = arith.constant 0 : index
    %3 = vector.load %arg1[%c0, %c0_1, %c0_2] : memref<2x16x16xf32, #tpu.memory_space<vmem>>, vector<2x16x16xf32>
    %c0_3 = arith.constant 0 : index
    %c0_4 = arith.constant 0 : index
    %c0_5 = arith.constant 0 : index
    %4 = vector.load %arg2[%c0_3, %c0_4, %c0_5] : memref<2x16x16xf32, #tpu.memory_space<vmem>>, vector<2x16x16xf32>
    %c0_6 = arith.constant 0 : index
    %c0_7 = arith.constant 0 : index
    %5 = vector.load %arg3[%c0_6, %c0_7] : memref<2x16xi32, #tpu.memory_space<vmem>>, vector<2x16xi32>
    %6 = arith.sitofp %5 : vector<2x16xi32> to vector<2x16xf32>
    %7 = math.absf %3 : vector<2x16x16xf32>
    %cst = arith.constant 0.000000e+00 : f32
    %8 = vector.broadcast %cst : f32 to vector<2x16x16xf32>
    %9 = arith.subf %8, %7 : vector<2x16x16xf32>
    %10 = math.exp %9 : vector<2x16x16xf32>
    %cst_8 = arith.constant 1.000000e+00 : f32
    %11 = vector.broadcast %cst_8 : f32 to vector<2x16x16xf32>
    %12 = arith.addf %11, %10 : vector<2x16x16xf32>
    %13 = math.log %12 : vector<2x16x16xf32>
    %cst_9 = arith.constant 0.000000e+00 : f32
    %14 = vector.broadcast %cst_9 : f32 to vector<2x16x16xf32>
    %15 = arith.maximumf %3, %14 : vector<2x16x16xf32>
    %16 = arith.mulf %3, %4 : vector<2x16x16xf32>
    %17 = arith.subf %15, %16 : vector<2x16x16xf32>
    %18 = arith.addf %17, %13 : vector<2x16x16xf32>
    %cst_10 = arith.constant 1.000000e+00 : f32
    %19 = vector.broadcast %cst_10 : f32 to vector<2x16x16xf32>
    %20 = arith.addf %19, %10 : vector<2x16x16xf32>
    %21 = tpu.reciprocal %20 {approx = true} : vector<2x16x16xf32> -> vector<2x16x16xf32>
    %cst_11 = arith.constant 0.000000e+00 : f32
    %22 = vector.broadcast %cst_11 : f32 to vector<2x16x16xf32>
    %23 = arith.cmpf oge, %3, %22 : vector<2x16x16xf32>
    %24 = arith.mulf %10, %21 : vector<2x16x16xf32>
    %25 = arith.select %23, %21, %24 : vector<2x16x16xi1>, vector<2x16x16xf32>
    %26 = arith.mulf %25, %4 : vector<2x16x16xf32>
    %cst_12 = arith.constant 1.000000e+00 : f32
    %27 = vector.broadcast %cst_12 : f32 to vector<2x16x16xf32>
    %28 = arith.subf %27, %25 : vector<2x16x16xf32>
    %cst_13 = arith.constant 1.000000e+00 : f32
    %29 = vector.broadcast %cst_13 : f32 to vector<2x16x16xf32>
    %30 = arith.subf %29, %4 : vector<2x16x16xf32>
    %31 = arith.mulf %28, %30 : vector<2x16x16xf32>
    %32 = arith.addf %26, %31 : vector<2x16x16xf32>
    %cst_14 = arith.constant 1.000000e+00 : f32
    %33 = vector.broadcast %cst_14 : f32 to vector<2x16x16xf32>
    %34 = arith.subf %33, %32 : vector<2x16x16xf32>
    %35 = arith.mulf %34, %34 : vector<2x16x16xf32>
    %cst_15 = arith.constant 2.500000e-01 : f32
    %36 = vector.broadcast %cst_15 : f32 to vector<2x16x16xf32>
    %37 = arith.mulf %36, %4 : vector<2x16x16xf32>
    %cst_16 = arith.constant 1.000000e+00 : f32
    %38 = vector.broadcast %cst_16 : f32 to vector<2x16x16xf32>
    %39 = arith.subf %38, %4 : vector<2x16x16xf32>
    %cst_17 = arith.constant 7.500000e-01 : f32
    %40 = vector.broadcast %cst_17 : f32 to vector<2x16x16xf32>
    %41 = arith.mulf %40, %39 : vector<2x16x16xf32>
    %42 = arith.addf %37, %41 : vector<2x16x16xf32>
    %43 = arith.mulf %42, %18 : vector<2x16x16xf32>
    %44 = arith.mulf %43, %35 : vector<2x16x16xf32>
    %45 = vector.shape_cast %6 : vector<2x16xf32> to vector<2x1x16xf32>
    %46 = vector.broadcast %45 : vector<2x1x16xf32> to vector<2x16x16xf32>
    %47 = arith.mulf %44, %46 : vector<2x16x16xf32>
    %c0_18 = arith.constant 0 : index
    %c0_19 = arith.constant 0 : index
    %c0_20 = arith.constant 0 : index
    %48 = vector.load %arg7[%c0_18, %c0_19, %c0_20] : memref<2x16x16xf32, #tpu.memory_space<vmem>>, vector<2x16x16xf32>
    %49 = arith.addf %48, %47 : vector<2x16x16xf32>
    %c0_21 = arith.constant 0 : index
    %c0_22 = arith.constant 0 : index
    %c0_23 = arith.constant 0 : index
    %50 = vector.load %arg7[%c0_21, %c0_22, %c0_23] : memref<2x16x16xf32, #tpu.memory_space<vmem>>, vector<2x16x16xf32>
    tpu.vector_store %arg7[%c0_21, %c0_22, %c0_23], %49 {strides = array<i32>} : memref<2x16x16xf32, #tpu.memory_space<vmem>>, vector<2x16x16xf32>,
    %c0_i32_24 = arith.constant 0 : i32
    %51 = arith.cmpi eq, %arg0, %c0_i32_24 : i32
    %52 = arith.extui %51 : i1 to i32
    %c0_i32_25 = arith.constant 0 : i32
    %53 = arith.cmpi ne, %52, %c0_i32_25 : i32
    scf.if %53 {
      %c0_26 = arith.constant 0 : index
      %c0_27 = arith.constant 0 : index
      %c0_28 = arith.constant 0 : index
      %54 = vector.load %arg7[%c0_26, %c0_27, %c0_28] : memref<2x16x16xf32, #tpu.memory_space<vmem>>, vector<2x16x16xf32>
      %55 = vector.shape_cast %54 : vector<2x16x16xf32> to vector<1x2x16x16xf32>
      %cst_29 = arith.constant dense<0.000000e+00> : vector<1xf32>
      %56 = vector.multi_reduction <add>, %55, %cst_29 [1, 2, 3] : vector<1x2x16x16xf32> to vector<1xf32>
      %57 = vector.shape_cast %56 : vector<1xf32> to vector<1x1x1x1xf32>
      %58 = vector.extract %57[0, 0, 0, 0] : f32 from vector<1x1x1x1xf32>
      %c0_30 = arith.constant 0 : index
      %c0_31 = arith.constant 0 : index
      %59 = vector.load %arg4[%c0_30, %c0_31] : memref<4x5xf32, #tpu.memory_space<vmem>>, vector<4x5xf32>
      %c0_32 = arith.constant 0 : index
      %c0_33 = arith.constant 0 : index
      %60 = vector.load %arg5[%c0_32, %c0_33] : memref<4x5xf32, #tpu.memory_space<vmem>>, vector<4x5xf32>
      %61 = arith.subf %59, %60 : vector<4x5xf32>
      %62 = math.absf %61 : vector<4x5xf32>
      %63 = vector.shape_cast %62 : vector<4x5xf32> to vector<1x4x5xf32>
      %cst_34 = arith.constant dense<0.000000e+00> : vector<1xf32>
      %64 = vector.multi_reduction <add>, %63, %cst_34 [1, 2] : vector<1x4x5xf32> to vector<1xf32>
      %65 = vector.shape_cast %64 : vector<1xf32> to vector<1x1x1xf32>
      %66 = vector.extract %65[0, 0, 0] : f32 from vector<1x1x1xf32>
      %67 = vector.extract_strided_slice %59 {offsets = [0, 0], sizes = [1, 5], strides = [1, 1]} : vector<4x5xf32> to vector<1x5xf32>
      %68 = vector.extract_strided_slice %59 {offsets = [1, 0], sizes = [1, 5], strides = [1, 1]} : vector<4x5xf32> to vector<1x5xf32>
      %69 = vector.extract_strided_slice %59 {offsets = [2, 0], sizes = [1, 5], strides = [1, 1]} : vector<4x5xf32> to vector<1x5xf32>
      %70 = vector.extract_strided_slice %59 {offsets = [3, 0], sizes = [1, 5], strides = [1, 1]} : vector<4x5xf32> to vector<1x5xf32>
      %71 = vector.extract_strided_slice %60 {offsets = [0, 0], sizes = [1, 5], strides = [1, 1]} : vector<4x5xf32> to vector<1x5xf32>
      %72 = vector.extract_strided_slice %60 {offsets = [1, 0], sizes = [1, 5], strides = [1, 1]} : vector<4x5xf32> to vector<1x5xf32>
      %73 = vector.extract_strided_slice %60 {offsets = [2, 0], sizes = [1, 5], strides = [1, 1]} : vector<4x5xf32> to vector<1x5xf32>
      %74 = vector.extract_strided_slice %60 {offsets = [3, 0], sizes = [1, 5], strides = [1, 1]} : vector<4x5xf32> to vector<1x5xf32>
      %cst_35 = arith.constant 5.000000e-01 : f32
      %75 = vector.broadcast %cst_35 : f32 to vector<1x5xf32>
      %76 = arith.mulf %75, %69 : vector<1x5xf32>
      %77 = arith.subf %67, %76 : vector<1x5xf32>
      %cst_36 = arith.constant 5.000000e-01 : f32
      %78 = vector.broadcast %cst_36 : f32 to vector<1x5xf32>
      %79 = arith.mulf %78, %70 : vector<1x5xf32>
      %80 = arith.subf %68, %79 : vector<1x5xf32>
      %cst_37 = arith.constant 5.000000e-01 : f32
      %81 = vector.broadcast %cst_37 : f32 to vector<1x5xf32>
      %82 = arith.mulf %81, %69 : vector<1x5xf32>
      %83 = arith.addf %67, %82 : vector<1x5xf32>
      %cst_38 = arith.constant 5.000000e-01 : f32
      %84 = vector.broadcast %cst_38 : f32 to vector<1x5xf32>
      %85 = arith.mulf %84, %70 : vector<1x5xf32>
      %86 = arith.addf %68, %85 : vector<1x5xf32>
      %cst_39 = arith.constant 5.000000e-01 : f32
      %87 = vector.broadcast %cst_39 : f32 to vector<1x5xf32>
      %88 = arith.mulf %87, %73 : vector<1x5xf32>
      %89 = arith.subf %71, %88 : vector<1x5xf32>
      %cst_40 = arith.constant 5.000000e-01 : f32
      %90 = vector.broadcast %cst_40 : f32 to vector<1x5xf32>
      %91 = arith.mulf %90, %74 : vector<1x5xf32>
      %92 = arith.subf %72, %91 : vector<1x5xf32>
      %cst_41 = arith.constant 5.000000e-01 : f32
      %93 = vector.broadcast %cst_41 : f32 to vector<1x5xf32>
      %94 = arith.mulf %93, %73 : vector<1x5xf32>
      %95 = arith.addf %71, %94 : vector<1x5xf32>
      %cst_42 = arith.constant 5.000000e-01 : f32
      %96 = vector.broadcast %cst_42 : f32 to vector<1x5xf32>
      %97 = arith.mulf %96, %74 : vector<1x5xf32>
      %98 = arith.addf %72, %97 : vector<1x5xf32>
      %99 = arith.subf %83, %77 : vector<1x5xf32>
      %100 = arith.subf %86, %80 : vector<1x5xf32>
      %101 = arith.mulf %99, %100 : vector<1x5xf32>
      %102 = arith.subf %95, %89 : vector<1x5xf32>
      %103 = arith.subf %98, %92 : vector<1x5xf32>
      %104 = arith.mulf %102, %103 : vector<1x5xf32>
      %105 = arith.maximumf %77, %89 : vector<1x5xf32>
      %106 = arith.maximumf %80, %92 : vector<1x5xf32>
      %107 = arith.minimumf %83, %95 : vector<1x5xf32>
      %108 = arith.minimumf %86, %98 : vector<1x5xf32>
      %109 = arith.subf %107, %105 : vector<1x5xf32>
      %cst_43 = arith.constant 0.000000e+00 : f32
      %110 = vector.broadcast %cst_43 : f32 to vector<1x5xf32>
      %111 = arith.maximumf %109, %110 : vector<1x5xf32>
      %112 = arith.subf %108, %106 : vector<1x5xf32>
      %cst_44 = arith.constant 0.000000e+00 : f32
      %113 = vector.broadcast %cst_44 : f32 to vector<1x5xf32>
      %114 = arith.maximumf %112, %113 : vector<1x5xf32>
      %115 = arith.mulf %111, %114 : vector<1x5xf32>
      %116 = arith.addf %101, %104 : vector<1x5xf32>
      %117 = arith.subf %116, %115 : vector<1x5xf32>
      %cst_45 = arith.constant 1.000000e-07 : f32
      %118 = vector.broadcast %cst_45 : f32 to vector<1x5xf32>
      %119 = arith.addf %117, %118 : vector<1x5xf32>
      %120 = arith.divf %115, %119 : vector<1x5xf32>
      %121 = arith.minimumf %77, %89 : vector<1x5xf32>
      %122 = arith.minimumf %80, %92 : vector<1x5xf32>
      %123 = arith.maximumf %83, %95 : vector<1x5xf32>
      %124 = arith.maximumf %86, %98 : vector<1x5xf32>
      %125 = arith.subf %123, %121 : vector<1x5xf32>
      %cst_46 = arith.constant 0.000000e+00 : f32
      %126 = vector.broadcast %cst_46 : f32 to vector<1x5xf32>
      %127 = arith.maximumf %125, %126 : vector<1x5xf32>
      %128 = arith.subf %124, %122 : vector<1x5xf32>
      %cst_47 = arith.constant 0.000000e+00 : f32
      %129 = vector.broadcast %cst_47 : f32 to vector<1x5xf32>
      %130 = arith.maximumf %128, %129 : vector<1x5xf32>
      %131 = arith.mulf %127, %130 : vector<1x5xf32>
      %132 = arith.subf %131, %117 : vector<1x5xf32>
      %cst_48 = arith.constant 1.000000e-07 : f32
      %133 = vector.broadcast %cst_48 : f32 to vector<1x5xf32>
      %134 = arith.addf %131, %133 : vector<1x5xf32>
      %135 = arith.divf %132, %134 : vector<1x5xf32>
      %136 = arith.subf %120, %135 : vector<1x5xf32>
      %cst_49 = arith.constant 1.000000e+00 : f32
      %137 = vector.broadcast %cst_49 : f32 to vector<1x5xf32>
      %138 = arith.subf %137, %136 : vector<1x5xf32>
      %139 = vector.shape_cast %138 : vector<1x5xf32> to vector<1x1x5xf32>
      %cst_50 = arith.constant dense<0.000000e+00> : vector<1xf32>
      %140 = vector.multi_reduction <add>, %139, %cst_50 [1, 2] : vector<1x1x5xf32> to vector<1xf32>
      %141 = vector.shape_cast %140 : vector<1xf32> to vector<1x1x1xf32>
      %142 = vector.extract %141[0, 0, 0] : f32 from vector<1x1x1xf32>
      %c0_51 = arith.constant 0 : index
      %c0_52 = arith.constant 0 : index
      %143 = memref.load %arg6[%c0_51, %c0_52] : memref<1x3xf32, #tpu.memory_space<smem>>
      memref.store %58, %arg6[%c0_51, %c0_52] : memref<1x3xf32, #tpu.memory_space<smem>>
      %c0_53 = arith.constant 0 : index
      %c1 = arith.constant 1 : index
      %144 = memref.load %arg6[%c0_53, %c1] : memref<1x3xf32, #tpu.memory_space<smem>>
      memref.store %66, %arg6[%c0_53, %c1] : memref<1x3xf32, #tpu.memory_space<smem>>
      %c0_54 = arith.constant 0 : index
      %c2 = arith.constant 2 : index
      %145 = memref.load %arg6[%c0_54, %c2] : memref<1x3xf32, #tpu.memory_space<smem>>
      memref.store %142, %arg6[%c0_54, %c2] : memref<1x3xf32, #tpu.memory_space<smem>>
    } else {
    }
    return
  }
  func.func @transform_0(%arg0: i32) -> (i32, i32, i32) {
    %c0_i32 = arith.constant 0 : i32
    %c0_i32_0 = arith.constant 0 : i32
    %c0_i32_1 = arith.constant 0 : i32
    return %c0_i32, %arg0, %c0_i32_0 : i32, i32, i32
  }
  func.func @transform_1(%arg0: i32) -> (i32, i32, i32) {
    %c0_i32 = arith.constant 0 : i32
    %c0_i32_0 = arith.constant 0 : i32
    %c0_i32_1 = arith.constant 0 : i32
    return %c0_i32, %arg0, %c0_i32_0 : i32, i32, i32
  }
  func.func @transform_2(%arg0: i32) -> (i32, i32) {
    %c0_i32 = arith.constant 0 : i32
    %c0_i32_0 = arith.constant 0 : i32
    %c0_i32_1 = arith.constant 0 : i32
    return %c0_i32, %c0_i32_0 : i32, i32
  }
  func.func @transform_3(%arg0: i32) -> (i32, i32) {
    %c0_i32 = arith.constant 0 : i32
    %c0_i32_0 = arith.constant 0 : i32
    %c0_i32_1 = arith.constant 0 : i32
    return %c0_i32, %c0_i32_0 : i32, i32
  }
  func.func @transform_4(%arg0: i32) -> (i32, i32) {
    %c0_i32 = arith.constant 0 : i32
    %c0_i32_0 = arith.constant 0 : i32
    %c0_i32_1 = arith.constant 0 : i32
    return %c0_i32, %c0_i32_0 : i32, i32
  }
  func.func @transform_5(%arg0: i32) -> (i32, i32) {
    %c0_i32 = arith.constant 0 : i32
    %c0_i32_0 = arith.constant 0 : i32
    %c0_i32_1 = arith.constant 0 : i32
    return %c0_i32, %c0_i32_0 : i32, i32
  }
}

</mosaic_0001>

<bundles_post_ra>
// kernel: tpu_custom_call.1
= control target key start
LH: loop header
LB: loop body
LE: loop exit
PB: predicated region body
PF: predicated region fallthrough
CT: control target
= control target key end

     0   :  { %10 = vsyncpa [#allocation4], 0  ;;  %s795_s0 = inlined_call_operand.hbm [shape: f32[2,16,16], index: 0, kind: input, shape index: {}]   ;;  %s796_s1 = inlined_call_operand.hbm [shape: f32[2,16,16], index: 1, kind: input, shape index: {}]   ;;  %s797_s2 = inlined_call_operand.hbm [shape: s32[2,16], index: 2, kind: input, shape index: {}]   ;;  %s798_s3 = inlined_call_operand.hbm [shape: f32[4,5], index: 3, kind: input, shape index: {}]   ;;  %s799_s4 = inlined_call_operand.hbm [shape: f32[4,5], index: 4, kind: input, shape index: {}]   ;;  %s800_s5 = inlined_call_operand.hbm [shape: f32[1,3], index: 5, kind: output, shape index: {}]  }
   0x1   :  { %11 = vsyncpa [#allocation7], 0 }
   0x2   :  { %12 = vsyncpa [#allocation10], 0 }
   0x3   :  { %13 = vsyncpa [#allocation5], 0  ;;  %s31_s20 = sshll.u32 %s796_s1, 4  ;;  %s574_s21 = smov [#allocation6]   ;;  %s32_s20 = int_to_ptr.hbm [resolvable:$true] %s31_s20 }
   0x4   :  { %s33_s22 = sshll.u32 %s574_s21, 4  ;;  %s56_s25 = sshll.u32 %s798_s3, 4  ;;  %s34_s22 = int_to_ptr.vmem [resolvable:$true] %s33_s22  ;;  %s57_s25 = int_to_ptr.hbm [resolvable:$true] %s56_s25 }
   0x5   :  { %s575_s26 = smov 128   ;;  %s576_s27 = smov 8  }
   0x6   :  { %39 = dma.hbm_to_vmem [thread:$0]  %s32_s20, 512, %s34_s22, [#allocation7], %s575_s26, %s575_s26, %s576_s27  }
   0x7   :  { %s577_s28 = smov [#allocation9]   ;;  %s18_s7 = sshll.u32 %s795_s0, 4  ;;  %s19_s7 = int_to_ptr.hbm [resolvable:$true] %s18_s7 }
   0x8   :  { %s58_s29 = sshll.u32 %s577_s28, 4  ;;  %s45_s9 = sshll.u32 %s797_s2, 4  ;;  %s59_s29 = int_to_ptr.vmem [resolvable:$true] %s58_s29  ;;  %s46_s9 = int_to_ptr.hbm [resolvable:$true] %s45_s9 }
   0x9   :  { %61 = dma.hbm_to_vmem [thread:$0]  %s57_s25, 64, %s59_s29, [#allocation10]  }
   0xa   :  { %s578_s10 = smov [#allocation3]   ;;  %s579_s3 = smov [#allocation8]  }
   0xb   :  { %s20_s11 = sshll.u32 %s578_s10, 4  ;;  %s47_s12 = sshll.u32 %s579_s3, 4  ;;  %s21_s11 = int_to_ptr.vmem [resolvable:$true] %s20_s11  ;;  %s48_s12 = int_to_ptr.vmem [resolvable:$true] %s47_s12 }
   0xc   :  { %26 = dma.hbm_to_vmem [thread:$0]  %s19_s7, 512, %s21_s11, [#allocation4], %s575_s26, %s575_s26, %s576_s27  }
   0xd   :  { %s67_s15 = sshll.u32 %s799_s4, 4  ;;  %s580_s0 = smov [#allocation11]   ;;  %s68_s15 = int_to_ptr.hbm [resolvable:$true] %s67_s15 }
   0xe   :  { %50 = dma.hbm_to_vmem [thread:$0]  %s46_s9, 32, %s48_s12, [#allocation7]  }
   0xf   :  { %s69_s16 = sshll.u32 %s580_s0, 4  ;;  %s70_s16 = int_to_ptr.vmem [resolvable:$true] %s69_s16 }
  0x10   :  { %72 = dma.hbm_to_vmem [thread:$0]  %s68_s15, 64, %s70_s16, [#allocation10]  }
  0x11   :  { %566 = dma.done.wait [#allocation4], 512  }
  0x12   :  { %567 = vsyncadd [#allocation4], 4294966784 }
  0x13   :  { %568 = dma.done.wait [#allocation7], 544  }
  0x14   :  { %569 = vsyncadd [#allocation7], 4294966752 }
  0x15   :  { %570 = dma.done.wait [#allocation10], 128  }
  0x16   :  { %571 = vsyncadd [#allocation10], 4294967168  ;;  %vm97_vm0 = vcmask 130048   ;;  %v581_v0 = vmov 0.0   ;;  %v632_v1 = vld [vmem:[#allocation3] sm:$0xff]  ;;  %v634_v2 = vld [vmem:[#allocation3 + $0x8] sm:$0xff] }
  0x17   :  { %98 = vst.msk [vmem:[#allocation2] sm:$0xff] %vm97_vm0, %v581_v0  ;;  %v636_v3 = vld [vmem:[#allocation3 + $0x10] sm:$0xff]  ;;  %v638_v4 = vld [vmem:[#allocation3 + $0x18] sm:$0xff]  ;;  %v112_v5 = vand.u32 2147483647, %v632_v1  ;;  %v644_v10 = vld [vmem:[#allocation6] sm:$0xff] }
  0x18   :  { %99 = vst.msk [vmem:[#allocation2 + $0x8] sm:$0xff] %vm97_vm0, %v581_v0  ;;  %v113_v6 = vand.u32 2147483647, %v634_v2  ;;  %v114_v7 = vand.u32 2147483647, %v636_v3  ;;  %v646_v12 = vld [vmem:[#allocation6 + $0x8] sm:$0xff]  ;;  %v144_v20 = vmul.f32 %v644_v10, %v632_v1 }
  0x19   :  { %100 = vst.msk [vmem:[#allocation2 + $0x10] sm:$0xff] %vm97_vm0, %v581_v0  ;;  %v115_v8 = vand.u32 2147483647, %v638_v4  ;;  %v116_v9 = vsub.f32 0.0, %v112_v5  ;;  %v140_v16 = vmax.f32 %v632_v1, 0.0  ;;  %v649_v17 = vld [vmem:[#allocation6 + $0x10] sm:$0xff]  ;;  %v145_v21 = vmul.f32 %v646_v12, %v634_v2 }
  0x1a   :  { %101 = vst.msk [vmem:[#allocation2 + $0x18] sm:$0xff] %vm97_vm0, %v581_v0  ;;  %v117_v11 = vsub.f32 0.0, %v113_v6  ;;  %v118_v13 = vsub.f32 0.0, %v114_v7  ;;  %v141_v19 = vmax.f32 %v634_v2, 0.0  ;;  %v656_v22 = vld [vmem:[#allocation6 + $0x18] sm:$0xff]  ;;  %v142_v25 = vmax.f32 %v636_v3, 0.0 }
  0x1b   :  { %v119_v14 = vsub.f32 0.0, %v115_v8  ;;  %v120_v15 = vmul.f32 1.442695, %v116_v9  ;;  %v659_v26 = vld [vmem:[#allocation8] sm:$0x3]  ;;  %v143_v27 = vmax.f32 %v638_v4, 0.0  ;;  %v146_v28 = vmul.f32 %v649_v17, %v636_v3 }
  0x1c   :  { %v122_v18 = vmul.f32 1.442695, %v117_v11  ;;  %v124_v23 = vmul.f32 1.442695, %v118_v13  ;;  %v147_v29 = vmul.f32 %v656_v22, %v638_v4  ;;  %v666_v30 = vld [vmem:[#allocation9] sm:$0xf]  ;;  %v111_v32 = vcvt.s32.f32 %v659_v26 }
  0x1d   :  { %406 = vpow2.f32 %v120_v15  ;;  %v126_v24 = vmul.f32 1.442695, %v119_v14  ;;  %v668_v31 = vld [vmem:[#allocation11] sm:$0xf]  ;;  %v671_v33 = vsub.f32 %v140_v16, %v144_v20  ;;  %v673_v34 = vsub.f32 %v141_v19, %v145_v21  ;;  %s378_s18 = sshll.u32 %s800_s5, 4  ;;  %s582_s21 = smov [#allocation12]   ;;  %s379_s18 = int_to_ptr.hbm [resolvable:$true] %s378_s18 }
  0x1e   :  { %408 = vpow2.f32 %v122_v18  ;;  %v675_v35 = vsub.f32 %v142_v25, %v146_v28  ;;  %v677_v36 = vsub.f32 %v143_v27, %v147_v29  ;;  %v180_v38 = vsub.f32 1.0, %v644_v10 }
  0x1f   :  { %410 = vpow2.f32 %v124_v23  ;;  %v181_v39 = vsub.f32 1.0, %v646_v12  ;;  %v281_v40 = vmul.f32 0.5, %v666_v30  ;;  %v287_v41 = vmul.f32 0.5, %v668_v31 }
  0x20   :  { %412 = vpow2.f32 %v126_v24  ;;  %v182_v44 = vsub.f32 1.0, %v649_v17  ;;  %v183_v45 = vsub.f32 1.0, %v656_v22  ;;  %v200_v46 = vmul.f32 0.25, %v644_v10 }
  0x21   :  { %v201_v49 = vmul.f32 0.25, %v646_v12  ;;  %v202_v50 = vmul.f32 0.25, %v649_v17  ;;  %v283_v51 = vrot.slane %v281_v40, 2  ;;  %v203_v54 = vmul.f32 0.25, %v656_v22 }
  0x22   :  { %v289_v55 = vrot.slane %v287_v41, 2  ;;  %vm160_vm1 = vcmp.ge.f32.partialorder %v632_v1, 0.0  ;;  %v204_v59 = vmul.f32 0.75, %v180_v38  ;;  %v205_v62 = vmul.f32 0.75, %v181_v39 }
  0x23   :  { %v679_v37 = vpop.eup %406  ;;  %v285_v57 = vsub.f32 %v666_v30, %v283_v51  ;;  %v286_v58 = vadd.f32 %v283_v51, %v666_v30  ;;  %v206_v63 = vmul.f32 0.75, %v182_v44  ;;  %v207_v14 = vmul.f32 0.75, %v183_v45 }
  0x24   :  { %v685_v42 = vpop.eup %408  ;;  %v128_v43 = vadd.f32 1.0, %v679_v37  ;;  %v291_v60 = vsub.f32 %v668_v31, %v289_v55  ;;  %v292_v61 = vadd.f32 %v289_v55, %v668_v31  ;;  %vm161_vm2 = vcmp.ge.f32.partialorder %v634_v2, 0.0 }
  0x25   :  { %v691_v47 = vpop.eup %410  ;;  %v129_v48 = vadd.f32 1.0, %v685_v42  ;;  %v293_v0 = vsub.f32 %v286_v58, %v285_v57  ;;  %vm162_vm3 = vcmp.ge.f32.partialorder %v636_v3, 0.0  ;;  %vm163_vm4 = vcmp.ge.f32.partialorder %v638_v4, 0.0 }
  0x26   :  { %v696_v52 = vpop.eup %412  ;;  %v130_v53 = vadd.f32 1.0, %v691_v47  ;;  %414 = vlog2.f32 %v128_v43  ;;  %v298_v5 = vsub.f32 %v292_v61, %v291_v60  ;;  %v303_v6 = vmax.f32 %v285_v57, %v291_v60 }
  0x27   :  { %v131_v56 = vadd.f32 1.0, %v696_v52  ;;  %416 = vlog2.f32 %v129_v48  ;;  %v304_v7 = vmin.f32 %v286_v58, %v292_v61  ;;  %v295_v8 = vrot.slane %v293_v0, 1 }
  0x28   :  { %418 = vlog2.f32 %v130_v53  ;;  %v329_v9 = vmin.f32 %v285_v57, %v291_v60  ;;  %v330_v11 = vmax.f32 %v286_v58, %v292_v61  ;;  %v300_v15 = vrot.slane %v298_v5, 1 }
  0x29   :  { %420 = vlog2.f32 %v131_v56  ;;  %v305_v16 = vsub.f32 %v304_v7, %v303_v6  ;;  %v297_v23 = vmul.f32 %v295_v8, %v293_v0  ;;  %v208_v28 = vadd.f32 %v204_v59, %v200_v46 }
  0x2a   :  { %422 = vrcp.f32 %v128_v43  ;;  %v331_v19 = vsub.f32 %v330_v11, %v329_v9  ;;  %v302_v24 = vmul.f32 %v300_v15, %v298_v5  ;;  %v719_v29 = vrot.slane %v111_v32, 1 }
  0x2b   :  { %424 = vrcp.f32 %v129_v48  ;;  %v306_v25 = vmax.f32 %v305_v16, 0.0  ;;  %v209_v43 = vadd.f32 %v205_v62, %v201_v49  ;;  %v210_v48 = vadd.f32 %v206_v63, %v202_v50 }
  0x2c   :  { %v415_v13 = vpop.eup %414  ;;  %426 = vrcp.f32 %v130_v53  ;;  %v332_v40 = vmax.f32 %v331_v19, 0.0  ;;  %v211_v51 = vadd.f32 %v207_v14, %v203_v54  ;;  %v311_v5 = vadd.f32 %v302_v24, %v297_v23 }
  0x2d   :  { %v417_v18 = vpop.eup %416  ;;  %428 = vrcp.f32 %v131_v56  ;;  %v133_v21 = vmul.f32 0.6931472, %v415_v13  ;;  %v308_v53 = vrot.slane %v306_v25, 1  ;;  %vm356_vm13 = vcmask 32768  }
  0x2e   :  { %v419_v20 = vpop.eup %418  ;;  %v135_v56 = vmul.f32 0.6931472, %v417_v18  ;;  %v334_v60 = vrot.slane %v332_v40, 1  ;;  %vm270_vm14 = vcmask 35840  }
  0x2f   :  { %v421_v27 = vpop.eup %420  ;;  %v137_v57 = vmul.f32 0.6931472, %v419_v20  ;;  %v152_v46 = vadd.f32 %v671_v33, %v133_v21  ;;  %v727_v50 = vmul.f32 %v308_v53, %v306_v25 }
  0x30   :  { %v423_v41 = vpop.eup %422  ;;  %v139_v0 = vmul.f32 0.6931472, %v421_v27  ;;  %v729_v54 = vmul.f32 %v334_v60, %v332_v40  ;;  %v231_v60 = vld [vmem:[#allocation2 + $0x8] sm:$0xff] }
  0x31   :  { %v425_v55 = vpop.eup %424  ;;  %v164_v58 = vmul.f32 %v423_v41, %v679_v37  ;;  %v748_v3 = vsub.f32 %v311_v5, %v727_v50  ;;  %v154_v15 = vadd.f32 %v675_v35, %v137_v57  ;;  %v212_v21 = vmul.f32 %v208_v28, %v152_v46 }
  0x32   :  { %v427_v61 = vpop.eup %426  ;;  %v165_v59 = vmul.f32 %v425_v55, %v685_v42  ;;  %v153_v42 = vadd.f32 %v673_v34, %v135_v56  ;;  %v754_v18 = vadd.f32 1e-07, %v729_v54  ;;  %v223_v28 = vperm.slane %v719_v29, 0  ;;  %v230_v56 = vld [vmem:[#allocation2] sm:$0xff] }
  0x33   :  { %v429_v6 = vpop.eup %428  ;;  %v166_v7 = vmul.f32 %v427_v61, %v691_v47  ;;  %v168_v49 = vsel %vm160_vm1, %v423_v41, %v164_v58 }
  0x34   :  { %v167_v37 = vmul.f32 %v429_v6, %v696_v52  ;;  %v169_v62 = vsel %vm161_vm2, %v425_v55, %v165_v59  ;;  %v172_v33 = vmul.f32 %v168_v49, %v644_v10  ;;  %v176_v63 = vsub.f32 1.0, %v168_v49  ;;  %v233_v59 = vld [vmem:[#allocation2 + $0x18] sm:$0xff] }
  0x35   :  { %v170_v47 = vsel %vm162_vm3, %v427_v61, %v166_v7  ;;  %v173_v1 = vmul.f32 %v169_v62, %v646_v12  ;;  %v177_v8 = vsub.f32 1.0, %v169_v62  ;;  %v155_v10 = vadd.f32 %v677_v36, %v139_v0  ;;  %v232_v61 = vld [vmem:[#allocation2 + $0x10] sm:$0xff] }
  0x36   :  { %v171_v9 = vsel %vm163_vm4, %v429_v6, %v167_v37  ;;  %v174_v11 = vmul.f32 %v170_v47, %v649_v17  ;;  %v178_v52 = vsub.f32 1.0, %v170_v47  ;;  %v184_v2 = vmul.f32 %v180_v38, %v176_v63 }
  0x37   :  { %v175_v13 = vmul.f32 %v171_v9, %v656_v22  ;;  %v179_v14 = vsub.f32 1.0, %v171_v9  ;;  %v185_v34 = vmul.f32 %v181_v39, %v177_v8  ;;  %v760_v12 = vadd.f32 1e-07, %v748_v3 }
  0x38   :  { %v186_v4 = vmul.f32 %v182_v44, %v178_v52  ;;  %v188_v16 = vadd.f32 %v184_v2, %v172_v33  ;;  %430 = vrcp.f32 %v754_v18  ;;  %v213_v44 = vmul.f32 %v209_v43, %v153_v42 }
  0x39   :  { %v187_v38 = vmul.f32 %v183_v45, %v179_v14  ;;  %v189_v19 = vadd.f32 %v185_v34, %v173_v1  ;;  %432 = vrcp.f32 %v760_v12  ;;  %v214_v36 = vmul.f32 %v210_v48, %v154_v15 }
  0x3a   :  { %v190_v39 = vadd.f32 %v186_v4, %v174_v11  ;;  %v192_v20 = vsub.f32 1.0, %v188_v16  ;;  %v222_v22 = vperm.slane %v111_v32, 0  ;;  %v215_v27 = vmul.f32 %v211_v51, %v155_v10 }
  0x3b   :  { %v191_v17 = vadd.f32 %v187_v38, %v175_v13  ;;  %v193_v35 = vsub.f32 1.0, %v189_v19  ;;  %vm344_vm5 = vweird.f32 %v754_v18  ;;  %vm319_vm6 = vweird.f32 %v760_v12 }
  0x3c   :  { %v194_v23 = vsub.f32 1.0, %v190_v39  ;;  %v196_v24 = vmul.f32 %v192_v20, %v192_v20  ;;  %v325_v26 = vand.u32 2147483648, %v760_v12  ;;  %v348_v29 = vand.u32 2147483647, %v754_v18 }
  0x3d   :  { %v195_v45 = vsub.f32 1.0, %v191_v17  ;;  %v197_v25 = vmul.f32 %v193_v35, %v193_v35  ;;  %v350_v7 = vand.u32 2147483648, %v754_v18  ;;  %v323_v42 = vand.u32 2147483647, %v760_v12 }
  0x3e   :  { %v198_v40 = vmul.f32 %v194_v23, %v194_v23  ;;  %v216_v41 = vmul.f32 %v212_v21, %v196_v24  ;;  %v431_v43 = vpop.eup %430  ;;  %v326_v11 = vor.u32 1.1754944e-38, %v325_v26  ;;  %v337_v52 = vsub.f32 %v729_v54, %v748_v3 }
  0x3f   :  { %v199_v53 = vmul.f32 %v195_v45, %v195_v45  ;;  %v217_v55 = vmul.f32 %v213_v44, %v197_v25  ;;  %v433_v32 = vpop.eup %432  ;;  %v340_v0 = vmul.f32 %v431_v43, %v754_v18  ;;  %vm345_vm7 = vweird.f32 %v431_v43 }
  0x40   :  { %v218_v57 = vmul.f32 %v214_v36, %v198_v40  ;;  %v226_v58 = vmul.f32 %v222_v22, %v216_v41  ;;  %v315_v6 = vmul.f32 %v433_v32, %v760_v12  ;;  %vm320_vm8 = vweird.f32 %v433_v32  ;;  %vm346_vm9 = vmor %vm344_vm5, %vm345_vm7 }
  0x41   :  { %v219_v48 = vmul.f32 %v215_v27, %v199_v53  ;;  %v227_v51 = vmul.f32 %v222_v22, %v217_v55  ;;  %v341_v62 = vsub.f32 1.0, %v340_v0  ;;  %v351_v9 = vor.u32 1.1754944e-38, %v350_v7  ;;  %vm321_vm10 = vmor %vm319_vm6, %vm320_vm8 }
  0x42   :  { %v228_v46 = vmul.f32 %v223_v28, %v218_v57  ;;  %v234_v5 = vadd.f32 %v230_v56, %v226_v58  ;;  %v316_v63 = vsub.f32 1.0, %v315_v6  ;;  %vm349_vm11 = vcmp.eq.f32.partialorder %v348_v29, 8.507059e+37 }
  0x43   :  { %v229_v49 = vmul.f32 %v223_v28, %v219_v48  ;;  %v235_v37 = vadd.f32 %v231_v60, %v227_v51  ;;  %v342_v1 = vmul.f32 %v431_v43, %v341_v62  ;;  %vm324_vm12 = vcmp.eq.f32.partialorder %v323_v42, 8.507059e+37 }
  0x44   :  { %v236_v33 = vadd.f32 %v232_v61, %v228_v46  ;;  %239 = vst.msk [vmem:[#allocation2] sm:$0xff] %vm97_vm0, %v234_v5  ;;  %v317_v8 = vmul.f32 %v433_v32, %v316_v63  ;;  %v268_v23 = vsub.f32 %v666_v30, %v668_v31 }
  0x45   :  { %v237_v47 = vadd.f32 %v233_v59, %v229_v49  ;;  %240 = vst.msk [vmem:[#allocation2 + $0x8] sm:$0xff] %vm97_vm0, %v235_v37  ;;  %v343_v2 = vadd.f32 %v431_v43, %v342_v1 }
  0x46   :  { %241 = vst.msk [vmem:[#allocation2 + $0x10] sm:$0xff] %vm97_vm0, %v236_v33  ;;  %v318_v13 = vadd.f32 %v433_v32, %v317_v8 }
  0x47   :  { %242 = vst.msk [vmem:[#allocation2 + $0x18] sm:$0xff] %vm97_vm0, %v237_v47  ;;  %v347_v14 = vsel %vm346_vm9, %v431_v43, %v343_v2 }
  0x48   :  { %v322_v34 = vsel %vm321_vm10, %v433_v32, %v318_v13  ;;  %v352_v15 = vsel %vm349_vm11, %v351_v9, %v347_v14 }
  0x49   :  { %v327_v16 = vsel %vm324_vm12, %v326_v11, %v322_v34  ;;  %v353_v18 = vmul.f32 %v352_v15, %v337_v52 }
  0x4a   :  { %v328_v19 = vmul.f32 %v327_v16, %v727_v50  ;;  %v269_v50 = vand.u32 2147483647, %v268_v23 }
  0x4b   :  { %v246_v4 = vld [vmem:[#allocation2] sm:$0xff] }
  0x4c   :  { %v247_v10 = vld [vmem:[#allocation2 + $0x8] sm:$0xff]  ;;  %v250_v38 = vsel %vm97_vm0, %v246_v4, 0.0  ;;  %v354_v21 = vsub.f32 %v328_v19, %v353_v18  ;;  %v271_v22 = vsel %vm270_vm14, %v269_v50, 0.0 }
  0x4d   :  { %v248_v12 = vld [vmem:[#allocation2 + $0x10] sm:$0xff]  ;;  %v251_v39 = vsel %vm97_vm0, %v247_v10, 0.0 }
  0x4e   :  { %v249_v20 = vld [vmem:[#allocation2 + $0x18] sm:$0xff]  ;;  %v252_v54 = vadd.f32 %v251_v39, %v250_v38  ;;  %v253_v3 = vsel %vm97_vm0, %v248_v12, 0.0  ;;  %v355_v44 = vsub.f32 1.0, %v354_v21 }
  0x4f   :  { %v255_v17 = vsel %vm97_vm0, %v249_v20, 0.0 }
  0x50   :  { %v254_v35 = vadd.f32 %v253_v3, %v252_v54  ;;  %v357_v36 = vsel %vm356_vm13, %v355_v44, 0.0 }
  0x51   :  { %358 = vadd.xlane.f32.xlu1 %v357_v36 }
  0x52   :  { %v256_v24 = vadd.f32 %v255_v17, %v254_v35 }
  0x54   :  { %257 = vadd.xlane.f32.xlu0 %v256_v24 }
  0x5c   :  { %272 = vadd.xlane.f32.xlu0 %v271_v22 }
  0xc4   :  { %v359_v45 = vpop.xlane.xlu1 %358 }
  0xc5   :  { %v360_v27 = vrot.slane %v359_v45, 4 }
  0xc7   :  { %v258_v25 = vpop.xlane.xlu0 %257  ;;  %v361_v28 = vadd.f32 %v360_v27, %v359_v45 }
  0xc8   :  { %v259_v40 = vrot.slane %v258_v25, 4 }
  0xc9   :  { %v362_v56 = vrot.slane %v361_v28, 2 }
  0xca   :  { %v260_v41 = vadd.f32 %v259_v40, %v258_v25 }
  0xcb   :  { %v363_v60 = vadd.f32 %v362_v56, %v361_v28 }
  0xcc   :  { %v261_v53 = vrot.slane %v260_v41, 2 }
  0xcd   :  { %v364_v48 = vrot.slane %v363_v60, 1 }
  0xce   :  { %v262_v55 = vadd.f32 %v261_v53, %v260_v41 }
  0xcf   :  { %v273_v43 = vpop.xlane.xlu0 %272  ;;  %v365_v0 = vadd.f32 %v364_v48, %v363_v60 }
  0xd0   :  { %v274_v57 = vrot.slane %v273_v43, 4  ;;  %v263_v30 = vrot.slane %v262_v55, 1 }
  0xd2   :  { %v275_v31 = vadd.f32 %v274_v57, %v273_v43  ;;  %v264_v58 = vadd.f32 %v263_v30, %v262_v55 }
  0xd4   :  { %v276_v26 = vrot.slane %v275_v31, 2  ;;  %391 = vpush %v264_v58 }
  0xd6   :  { %v277_v32 = vadd.f32 %v276_v26, %v275_v31 }
  0xd8   :  { %v278_v51 = vrot.slane %v277_v32, 1 }
  0xda   :  { %v279_v61 = vadd.f32 %v278_v51, %v277_v32 }
  0xdc   :  { %393 = vpush %v279_v61 }
  0xdd   :  { %395 = vpush %v365_v0 }
 0x105   :  { %s392_s2 = spop %391 }
 0x106   :  { %368 = sst [smem:[#allocation12]] %s392_s2 }
 0x10d   :  { %s394_s19 = spop %393 }
 0x10e   :  { %370 = sst [smem:[#allocation12 + $0x1]] %s394_s19  ;;  %s396_s20 = spop %395 }
 0x10f   :  { %372 = sst [smem:[#allocation12 + $0x2]] %s396_s20 }
 0x110   :  { %381 = dma.smem_to_hbm %s582_s21, 16, %s379_s18, [#allocation5]  }
 0x111   :  { %572 = dma.done.wait [#allocation5], 16  }
 0x112   :  { %573 = vsyncadd [#allocation5], 4294967280 }
 0x113   :  { %386 = sfence }
 0x114   :  { %387 = vsyncpa [#allocation4], 1 }
 0x115   :  { %388 = vsyncpa [#allocation7], 1 }
 0x116   :  { %389 = vsyncpa [#allocation10], 1 }
 0x117   :  { %390 = vsyncpa [#allocation5], 1 }

</bundles_post_ra>
